<compile_context>
chip_gen: v7x
topology: tpu7x:2x2x1
jax: 0.10.0
libtpu: 0.0.40
codegen_flags: <defaults>
</compile_context>

<pallas_src>
import functools

import jax
import jax.numpy as jnp
from jax import lax
from jax.experimental import pallas as pl
from jax.experimental.pallas import tpu as pltpu

BN_EPS = 1e-5


def _stats_kernel(xe_ref, xo_ref, w0_ref, w1_ref, sum_ref, sumsq_ref):
    # xe_ref/xo_ref: [1, C, TMF]  even/odd frequency taps (M on lanes)
    # w0_ref/w1_ref: [C, C]       conv taps k=0 / k=1
    # sum_ref/sumsq_ref: [C, 1]   per-channel accumulators (VMEM-resident
    #                             across the whole grid; written back once)
    @pl.when(jnp.logical_and(pl.program_id(0) == 0, pl.program_id(1) == 0))
    def _():
        sum_ref[...] = jnp.zeros_like(sum_ref)
        sumsq_ref[...] = jnp.zeros_like(sumsq_ref)

    y = jnp.dot(w0_ref[...], xe_ref[0], preferred_element_type=jnp.float32)
    y = y + jnp.dot(w1_ref[...], xo_ref[0], preferred_element_type=jnp.float32)
    sum_ref[...] += jnp.sum(y, axis=1, keepdims=True)
    sumsq_ref[...] += jnp.sum(y * y, axis=1, keepdims=True)


def _norm_kernel(xe_ref, xo_ref, w0_ref, w1_ref, scale_ref, shift_ref, o_ref):
    # Recompute the (cheap, <2% MXU) conv for this tile and apply the folded
    # BatchNorm: o = y * scale + shift   (2 VPU ops / element).
    y = jnp.dot(w0_ref[...], xe_ref[0], preferred_element_type=jnp.float32)
    y = y + jnp.dot(w1_ref[...], xo_ref[0], preferred_element_type=jnp.float32)
    o_ref[0] = (y * scale_ref[...] + shift_ref[...]).astype(o_ref.dtype)


def _pick_m_tile(total, cap=2048):
    """Largest tile <= cap along the lane (M-per-batch) axis.

    Either the full extent (always legal as a block dim) or a multiple of 128
    that divides it, so there are never partial tiles to mask.
    """
    if total <= cap:
        return total
    t = (cap // 128) * 128
    while t >= 128:
        if total % t == 0:
            return t
        t -= 128
    return total


@jax.jit
def tic_sampling_forward(x, w, b, gamma, beta):
    """x: [B, C, T, F] float32 -> [B, C, T, F//2] float32."""
    del b  # Conv bias cancels exactly under training-mode BN (in y - mean, and
    #        it does not affect the variance) -> dead work, dropped.
    B, C, T, Fdim = x.shape
    Fo = Fdim // 2
    TFo = T * Fo
    M = B * TFo
    TMF = _pick_m_tile(TFo)
    J = TFo // TMF

    # Layout plumbing (no HBM transposes): split even/odd frequency taps so the
    # stride-2 Conv1d is two [C,C] @ [C, TMF] matmuls with M on the lane axis.
    x5 = x.reshape(B, C, T, Fo, 2)
    x_even = x5[..., 0].reshape(B, C, TFo)
    x_odd = x5[..., 1].reshape(B, C, TFo)
    w0 = w[:, :, 0]  # [C_out, C_in]
    w1 = w[:, :, 1]

    x_spec = pl.BlockSpec((1, C, TMF), lambda bi, j: (bi, 0, j))
    w_spec = pl.BlockSpec((C, C), lambda bi, j: (0, 0))
    col_spec = pl.BlockSpec((C, 1), lambda bi, j: (0, 0))

    # ---- Pass 1: per-channel sum / sum-of-squares of the conv output. ----
    sum_c, sumsq_c = pl.pallas_call(
        _stats_kernel,
        out_shape=(
            jax.ShapeDtypeStruct((C, 1), jnp.float32),
            jax.ShapeDtypeStruct((C, 1), jnp.float32),
        ),
        grid=(B, J),
        in_specs=[x_spec, x_spec, w_spec, w_spec],
        out_specs=(col_spec, col_spec),
        compiler_params=pltpu.CompilerParams(
            dimension_semantics=("arbitrary", "arbitrary")  # accumulator grid
        ),
        cost_estimate=pl.CostEstimate(
            flops=4 * C * C * M + 4 * C * M,
            transcendentals=0,
            bytes_accessed=2 * M * C * 4 + 2 * C * C * 4 + 2 * C * 4,
        ),
    )(x_even, x_odd, w0, w1)

    # Fold BN into a per-channel scale/shift (tiny [C] math outside the kernel).
    inv_m = 1.0 / float(M)
    mean = sum_c * inv_m
    var = jnp.maximum(sumsq_c * inv_m - mean * mean, 0.0)  # biased variance
    scale = gamma.reshape(C, 1) * lax.rsqrt(var + BN_EPS)
    shift = beta.reshape(C, 1) - scale * mean

    # ---- Pass 2: recompute conv per tile and normalize (fully parallel). ----
    out = pl.pallas_call(
        _norm_kernel,
        out_shape=jax.ShapeDtypeStruct((B, C, TFo), jnp.float32),
        grid=(B, J),
        in_specs=[x_spec, x_spec, w_spec, w_spec, col_spec, col_spec],
        out_specs=pl.BlockSpec((1, C, TMF), lambda bi, j: (bi, 0, j)),
        compiler_params=pltpu.CompilerParams(
            dimension_semantics=("parallel", "parallel")
        ),
        cost_estimate=pl.CostEstimate(
            flops=4 * C * C * M + 2 * C * M,
            transcendentals=0,
            bytes_accessed=3 * M * C * 4 + 2 * C * C * 4 + 2 * C * 4,
        ),
    )(x_even, x_odd, w0, w1, scale, shift)

    # [B, C, T*Fo] -> [B, C, T, Fo]   (pure reshape; no transpose needed)
    return out.reshape(B, C, T, Fo)


def reference_forward(x, w, b, gamma, beta):
    """Pure-JAX reference mirroring the PyTorch module (downsampling, train BN)."""
    B, C, T, Fdim = x.shape
    Fo = Fdim // 2
    xp = x.reshape(B, C, T, Fo, 2)
    # Conv1d(kernel=2, stride=2) applied per (b, t) slice along F (bias kept
    # here to verify the in-kernel bias-drop is exact).
    y = jnp.einsum("bctfk,ock->botf", xp, w) + b[None, :, None, None]
    mean = jnp.mean(y, axis=(0, 2, 3), keepdims=True)
    var = jnp.mean((y - mean) ** 2, axis=(0, 2, 3), keepdims=True)  # biased
    yhat = (y - mean) / jnp.sqrt(var + BN_EPS)
    return gamma[None, :, None, None] * yhat + beta[None, :, None, None]


if __name__ == "__main__":
    # BatchNorm2d(24) in the module hardcodes 24 channels => C must be 24.
    B, C, T, Fdim = 2, 24, 8, 16

    key = jax.random.PRNGKey(0)
    kx, kw, kb = jax.random.split(key, 3)

    x = jax.random.normal(kx, (B, C, T, Fdim), dtype=jnp.float32)

    # Deterministic parameter init (shapes from the module's __init__).
    fan_in = C * 2
    bound = 1.0 / (fan_in ** 0.5)
    w = jax.random.uniform(
        kw, (C, C, 2), dtype=jnp.float32, minval=-bound, maxval=bound
    )
    b = jax.random.uniform(
        kb, (C,), dtype=jnp.float32, minval=-bound, maxval=bound
    )
    gamma = jnp.ones((C,), dtype=jnp.float32)   # BN weight init
    beta = jnp.zeros((C,), dtype=jnp.float32)   # BN bias init

    out = tic_sampling_forward(x, w, b, gamma, beta)
    out = jax.block_until_ready(out)

    ref = reference_forward(x, w, b, gamma, beta)
    assert out.shape == (B, C, T, Fdim // 2), out.shape
    assert jnp.allclose(out, ref, atol=1e-4, rtol=1e-4), (
        float(jnp.max(jnp.abs(out - ref)))
    )

    print("KERNEL_OK")
</pallas_src>

<mosaic_0001>
module attributes {stable_mosaic.version = 11 : i64} {
  func.func @_stats_kernel(%arg0: i32, %arg1: i32, %arg2: memref<1x24x64xf32, #tpu.memory_space<vmem>>, %arg3: memref<1x24x64xf32, #tpu.memory_space<vmem>>, %arg4: memref<24x24xf32, #tpu.memory_space<vmem>>, %arg5: memref<24x24xf32, #tpu.memory_space<vmem>>, %arg6: memref<24x1xf32, #tpu.memory_space<vmem>>, %arg7: memref<24x1xf32, #tpu.memory_space<vmem>>) attributes {dimension_semantics = [#tpu.dimension_semantics<arbitrary>, #tpu.dimension_semantics<arbitrary>], iteration_bounds = array<i64: 2, 1>, scalar_prefetch = 0 : i64, scratch_operands = 0 : i64, tpu.core_type = #tpu.core_type<tc>, window_params = [{transform_indices = @transform_0, window_bounds = array<i64: 1, 24, 64>}, {transform_indices = @transform_1, window_bounds = array<i64: 1, 24, 64>}, {pipeline_mode = #tpu.pipeline_mode<synchronous>, transform_indices = @transform_2, window_bounds = array<i64: 24, 24>}, {pipeline_mode = #tpu.pipeline_mode<synchronous>, transform_indices = @transform_3, window_bounds = array<i64: 24, 24>}, {pipeline_mode = #tpu.pipeline_mode<synchronous>, transform_indices = @transform_4, window_bounds = array<i64: 24, 1>}, {pipeline_mode = #tpu.pipeline_mode<synchronous>, transform_indices = @transform_5, window_bounds = array<i64: 24, 1>}]} {
    %c0_i32 = arith.constant 0 : i32
    %0 = arith.cmpi eq, %arg0, %c0_i32 : i32
    %c0_i32_0 = arith.constant 0 : i32
    %1 = arith.cmpi eq, %arg1, %c0_i32_0 : i32
    %2 = arith.andi %0, %1 : i1
    %3 = arith.extui %2 : i1 to i32
    %c0_i32_1 = arith.constant 0 : i32
    %4 = arith.cmpi ne, %3, %c0_i32_1 : i32
    scf.if %4 {
      %cst_22 = arith.constant 0.000000e+00 : f32
      %25 = vector.broadcast %cst_22 : f32 to vector<24x1xf32>
      %c0_23 = arith.constant 0 : index
      %c0_24 = arith.constant 0 : index
      %26 = vector.load %arg6[%c0_23, %c0_24] : memref<24x1xf32, #tpu.memory_space<vmem>>, vector<24x1xf32>
      tpu.vector_store %arg6[%c0_23, %c0_24], %25 {strides = array<i32>} : memref<24x1xf32, #tpu.memory_space<vmem>>, vector<24x1xf32>,
      %cst_25 = arith.constant 0.000000e+00 : f32
      %27 = vector.broadcast %cst_25 : f32 to vector<24x1xf32>
      %c0_26 = arith.constant 0 : index
      %c0_27 = arith.constant 0 : index
      %28 = vector.load %arg7[%c0_26, %c0_27] : memref<24x1xf32, #tpu.memory_space<vmem>>, vector<24x1xf32>
      tpu.vector_store %arg7[%c0_26, %c0_27], %27 {strides = array<i32>} : memref<24x1xf32, #tpu.memory_space<vmem>>, vector<24x1xf32>,
    } else {
    }
    %c0 = arith.constant 0 : index
    %c0_2 = arith.constant 0 : index
    %5 = vector.load %arg4[%c0, %c0_2] : memref<24x24xf32, #tpu.memory_space<vmem>>, vector<24x24xf32>
    %c0_3 = arith.constant 0 : index
    %c0_4 = arith.constant 0 : index
    %c0_5 = arith.constant 0 : index
    %6 = vector.load %arg2[%c0_3, %c0_4, %c0_5] : memref<1x24x64xf32, #tpu.memory_space<vmem>>, vector<1x24x64xf32>
    %7 = vector.shape_cast %6 : vector<1x24x64xf32> to vector<24x64xf32>
    %cst = arith.constant dense<0.000000e+00> : vector<24x64xf32>
    %8 = tpu.matmul %5, %7, %cst {dimension_numbers = #tpu.dot_dimension_numbers<[1], [0], [0], [1], [0, 0, 1, 1], [], []>} : vector<24x24xf32>, vector<24x64xf32>, vector<24x64xf32> -> vector<24x64xf32>
    %c0_6 = arith.constant 0 : index
    %c0_7 = arith.constant 0 : index
    %9 = vector.load %arg5[%c0_6, %c0_7] : memref<24x24xf32, #tpu.memory_space<vmem>>, vector<24x24xf32>
    %c0_8 = arith.constant 0 : index
    %c0_9 = arith.constant 0 : index
    %c0_10 = arith.constant 0 : index
    %10 = vector.load %arg3[%c0_8, %c0_9, %c0_10] : memref<1x24x64xf32, #tpu.memory_space<vmem>>, vector<1x24x64xf32>
    %11 = vector.shape_cast %10 : vector<1x24x64xf32> to vector<24x64xf32>
    %cst_11 = arith.constant dense<0.000000e+00> : vector<24x64xf32>
    %12 = tpu.matmul %9, %11, %cst_11 {dimension_numbers = #tpu.dot_dimension_numbers<[1], [0], [0], [1], [0, 0, 1, 1], [], []>} : vector<24x24xf32>, vector<24x64xf32>, vector<24x64xf32> -> vector<24x64xf32>
    %13 = arith.addf %8, %12 : vector<24x64xf32>
    %c0_12 = arith.constant 0 : index
    %c0_13 = arith.constant 0 : index
    %14 = vector.load %arg6[%c0_12, %c0_13] : memref<24x1xf32, #tpu.memory_space<vmem>>, vector<24x1xf32>
    %cst_14 = arith.constant dense<0.000000e+00> : vector<24xf32>
    %15 = vector.multi_reduction <add>, %13, %cst_14 [1] : vector<24x64xf32> to vector<24xf32>
    %16 = vector.shape_cast %15 : vector<24xf32> to vector<24x1xf32>
    %17 = arith.addf %14, %16 : vector<24x1xf32>
    %c0_15 = arith.constant 0 : index
    %c0_16 = arith.constant 0 : index
    %18 = vector.load %arg6[%c0_15, %c0_16] : memref<24x1xf32, #tpu.memory_space<vmem>>, vector<24x1xf32>
    tpu.vector_store %arg6[%c0_15, %c0_16], %17 {strides = array<i32>} : memref<24x1xf32, #tpu.memory_space<vmem>>, vector<24x1xf32>,
    %c0_17 = arith.constant 0 : index
    %c0_18 = arith.constant 0 : index
    %19 = vector.load %arg7[%c0_17, %c0_18] : memref<24x1xf32, #tpu.memory_space<vmem>>, vector<24x1xf32>
    %20 = arith.mulf %13, %13 : vector<24x64xf32>
    %cst_19 = arith.constant dense<0.000000e+00> : vector<24xf32>
    %21 = vector.multi_reduction <add>, %20, %cst_19 [1] : vector<24x64xf32> to vector<24xf32>
    %22 = vector.shape_cast %21 : vector<24xf32> to vector<24x1xf32>
    %23 = arith.addf %19, %22 : vector<24x1xf32>
    %c0_20 = arith.constant 0 : index
    %c0_21 = arith.constant 0 : index
    %24 = vector.load %arg7[%c0_20, %c0_21] : memref<24x1xf32, #tpu.memory_space<vmem>>, vector<24x1xf32>
    tpu.vector_store %arg7[%c0_20, %c0_21], %23 {strides = array<i32>} : memref<24x1xf32, #tpu.memory_space<vmem>>, vector<24x1xf32>,
    return
  }
  func.func @transform_0(%arg0: i32, %arg1: i32) -> (i32, i32, i32) {
    %c0_i32 = arith.constant 0 : i32
    %c0_i32_0 = arith.constant 0 : i32
    return %arg0, %c0_i32, %arg1 : i32, i32, i32
  }
  func.func @transform_1(%arg0: i32, %arg1: i32) -> (i32, i32, i32) {
    %c0_i32 = arith.constant 0 : i32
    %c0_i32_0 = arith.constant 0 : i32
    return %arg0, %c0_i32, %arg1 : i32, i32, i32
  }
  func.func @transform_2(%arg0: i32, %arg1: i32) -> (i32, i32) {
    %c0_i32 = arith.constant 0 : i32
    %c0_i32_0 = arith.constant 0 : i32
    %c0_i32_1 = arith.constant 0 : i32
    return %c0_i32, %c0_i32_0 : i32, i32
  }
  func.func @transform_3(%arg0: i32, %arg1: i32) -> (i32, i32) {
    %c0_i32 = arith.constant 0 : i32
    %c0_i32_0 = arith.constant 0 : i32
    %c0_i32_1 = arith.constant 0 : i32
    return %c0_i32, %c0_i32_0 : i32, i32
  }
  func.func @transform_4(%arg0: i32, %arg1: i32) -> (i32, i32) {
    %c0_i32 = arith.constant 0 : i32
    %c0_i32_0 = arith.constant 0 : i32
    %c0_i32_1 = arith.constant 0 : i32
    return %c0_i32, %c0_i32_0 : i32, i32
  }
  func.func @transform_5(%arg0: i32, %arg1: i32) -> (i32, i32) {
    %c0_i32 = arith.constant 0 : i32
    %c0_i32_0 = arith.constant 0 : i32
    %c0_i32_1 = arith.constant 0 : i32
    return %c0_i32, %c0_i32_0 : i32, i32
  }
}

module attributes {stable_mosaic.version = 11 : i64} {
  func.func @_norm_kernel(%arg0: i32, %arg1: i32, %arg2: memref<1x24x64xf32, #tpu.memory_space<vmem>>, %arg3: memref<1x24x64xf32, #tpu.memory_space<vmem>>, %arg4: memref<24x24xf32, #tpu.memory_space<vmem>>, %arg5: memref<24x24xf32, #tpu.memory_space<vmem>>, %arg6: memref<24x1xf32, #tpu.memory_space<vmem>>, %arg7: memref<24x1xf32, #tpu.memory_space<vmem>>, %arg8: memref<1x24x64xf32, #tpu.memory_space<vmem>>) attributes {dimension_semantics = [#tpu.dimension_semantics<parallel>, #tpu.dimension_semantics<parallel>], iteration_bounds = array<i64: 2, 1>, scalar_prefetch = 0 : i64, scratch_operands = 0 : i64, tpu.core_type = #tpu.core_type<tc>, window_params = [{transform_indices = @transform_0, window_bounds = array<i64: 1, 24, 64>}, {transform_indices = @transform_1, window_bounds = array<i64: 1, 24, 64>}, {pipeline_mode = #tpu.pipeline_mode<synchronous>, transform_indices = @transform_2, window_bounds = array<i64: 24, 24>}, {pipeline_mode = #tpu.pipeline_mode<synchronous>, transform_indices = @transform_3, window_bounds = array<i64: 24, 24>}, {pipeline_mode = #tpu.pipeline_mode<synchronous>, transform_indices = @transform_4, window_bounds = array<i64: 24, 1>}, {pipeline_mode = #tpu.pipeline_mode<synchronous>, transform_indices = @transform_5, window_bounds = array<i64: 24, 1>}, {transform_indices = @transform_6, window_bounds = array<i64: 1, 24, 64>}]} {
    %c0 = arith.constant 0 : index
    %c0_0 = arith.constant 0 : index
    %0 = vector.load %arg4[%c0, %c0_0] : memref<24x24xf32, #tpu.memory_space<vmem>>, vector<24x24xf32>
    %c0_1 = arith.constant 0 : index
    %c0_2 = arith.constant 0 : index
    %c0_3 = arith.constant 0 : index
    %1 = vector.load %arg2[%c0_1, %c0_2, %c0_3] : memref<1x24x64xf32, #tpu.memory_space<vmem>>, vector<1x24x64xf32>
    %2 = vector.shape_cast %1 : vector<1x24x64xf32> to vector<24x64xf32>
    %cst = arith.constant dense<0.000000e+00> : vector<24x64xf32>
    %3 = tpu.matmul %0, %2, %cst {dimension_numbers = #tpu.dot_dimension_numbers<[1], [0], [0], [1], [0, 0, 1, 1], [], []>} : vector<24x24xf32>, vector<24x64xf32>, vector<24x64xf32> -> vector<24x64xf32>
    %c0_4 = arith.constant 0 : index
    %c0_5 = arith.constant 0 : index
    %4 = vector.load %arg5[%c0_4, %c0_5] : memref<24x24xf32, #tpu.memory_space<vmem>>, vector<24x24xf32>
    %c0_6 = arith.constant 0 : index
    %c0_7 = arith.constant 0 : index
    %c0_8 = arith.constant 0 : index
    %5 = vector.load %arg3[%c0_6, %c0_7, %c0_8] : memref<1x24x64xf32, #tpu.memory_space<vmem>>, vector<1x24x64xf32>
    %6 = vector.shape_cast %5 : vector<1x24x64xf32> to vector<24x64xf32>
    %cst_9 = arith.constant dense<0.000000e+00> : vector<24x64xf32>
    %7 = tpu.matmul %4, %6, %cst_9 {dimension_numbers = #tpu.dot_dimension_numbers<[1], [0], [0], [1], [0, 0, 1, 1], [], []>} : vector<24x24xf32>, vector<24x64xf32>, vector<24x64xf32> -> vector<24x64xf32>
    %8 = arith.addf %3, %7 : vector<24x64xf32>
    %c0_10 = arith.constant 0 : index
    %c0_11 = arith.constant 0 : index
    %9 = vector.load %arg6[%c0_10, %c0_11] : memref<24x1xf32, #tpu.memory_space<vmem>>, vector<24x1xf32>
    %10 = vector.broadcast %9 : vector<24x1xf32> to vector<24x64xf32>
    %11 = arith.mulf %8, %10 : vector<24x64xf32>
    %c0_12 = arith.constant 0 : index
    %c0_13 = arith.constant 0 : index
    %12 = vector.load %arg7[%c0_12, %c0_13] : memref<24x1xf32, #tpu.memory_space<vmem>>, vector<24x1xf32>
    %13 = vector.broadcast %12 : vector<24x1xf32> to vector<24x64xf32>
    %14 = arith.addf %11, %13 : vector<24x64xf32>
    %c0_14 = arith.constant 0 : index
    %c0_15 = arith.constant 0 : index
    %c0_16 = arith.constant 0 : index
    %15 = vector.load %arg8[%c0_14, %c0_15, %c0_16] : memref<1x24x64xf32, #tpu.memory_space<vmem>>, vector<1x24x64xf32>
    %16 = vector.shape_cast %15 : vector<1x24x64xf32> to vector<24x64xf32>
    %17 = vector.shape_cast %14 : vector<24x64xf32> to vector<1x24x64xf32>
    tpu.vector_store %arg8[%c0_14, %c0_15, %c0_16], %17 {strides = array<i32>} : memref<1x24x64xf32, #tpu.memory_space<vmem>>, vector<1x24x64xf32>,
    return
  }
  func.func @transform_0(%arg0: i32, %arg1: i32) -> (i32, i32, i32) {
    %c0_i32 = arith.constant 0 : i32
    %c0_i32_0 = arith.constant 0 : i32
    return %arg0, %c0_i32, %arg1 : i32, i32, i32
  }
  func.func @transform_1(%arg0: i32, %arg1: i32) -> (i32, i32, i32) {
    %c0_i32 = arith.constant 0 : i32
    %c0_i32_0 = arith.constant 0 : i32
    return %arg0, %c0_i32, %arg1 : i32, i32, i32
  }
  func.func @transform_2(%arg0: i32, %arg1: i32) -> (i32, i32) {
    %c0_i32 = arith.constant 0 : i32
    %c0_i32_0 = arith.constant 0 : i32
    %c0_i32_1 = arith.constant 0 : i32
    return %c0_i32, %c0_i32_0 : i32, i32
  }
  func.func @transform_3(%arg0: i32, %arg1: i32) -> (i32, i32) {
    %c0_i32 = arith.constant 0 : i32
    %c0_i32_0 = arith.constant 0 : i32
    %c0_i32_1 = arith.constant 0 : i32
    return %c0_i32, %c0_i32_0 : i32, i32
  }
  func.func @transform_4(%arg0: i32, %arg1: i32) -> (i32, i32) {
    %c0_i32 = arith.constant 0 : i32
    %c0_i32_0 = arith.constant 0 : i32
    %c0_i32_1 = arith.constant 0 : i32
    return %c0_i32, %c0_i32_0 : i32, i32
  }
  func.func @transform_5(%arg0: i32, %arg1: i32) -> (i32, i32) {
    %c0_i32 = arith.constant 0 : i32
    %c0_i32_0 = arith.constant 0 : i32
    %c0_i32_1 = arith.constant 0 : i32
    return %c0_i32, %c0_i32_0 : i32, i32
  }
  func.func @transform_6(%arg0: i32, %arg1: i32) -> (i32, i32, i32) {
    %c0_i32 = arith.constant 0 : i32
    %c0_i32_0 = arith.constant 0 : i32
    return %arg0, %c0_i32, %arg1 : i32, i32, i32
  }
}

</mosaic_0001>

<bundles_post_ra>
// kernel: tic_sampling_forward.3
= control target key start
LH: loop header
LB: loop body
LE: loop exit
PB: predicated region body
PF: predicated region fallthrough
CT: control target
= control target key end

     0   :  { %s813_s21 = smov 0   ;;  %s815_s22 = smov 0   ;;  %s905_s0 = inlined_call_operand.vmem [shape: f32[2,24,64], index: 0, kind: input, shape index: {}]   ;;  %s906_s1 = inlined_call_operand.vmem [shape: f32[2,24,64], index: 1, kind: input, shape index: {}]   ;;  %s907_s2 = inlined_call_operand.vmem [shape: f32[24,24], index: 2, kind: input, shape index: {}]   ;;  %s908_s3 = inlined_call_operand.vmem [shape: f32[24,24], index: 3, kind: input, shape index: {}]   ;;  %s909_s4 = inlined_call_operand.vmem [shape: f32[24,1], index: 4, kind: input, shape index: {}]   ;;  %s910_s5 = inlined_call_operand.vmem [shape: f32[24,1], index: 5, kind: input, shape index: {}]   ;;  %s911_s6 = inlined_call_operand.vmem [shape: f32[2,24,64], index: 6, kind: output, shape index: {}]  }
   0x1   :  { %s817_s23 = smov 0  }
   0x2 LB: > { %s28_s24 = sadd.s32 1, %s768_s22  ;;  %p656_p0 = scmp.ge.s32.totalorder %s772_s23, 1  ;;  %s772_s23 = sphi %s817_s23, %s16_s23   ;;  %s768_s22 = sphi %s815_s22, %s913_s22   ;;  %s764_s21 = sphi %s813_s21, %s912_s21  }
   0x3   : > { %p30_p1 = scmp.ge.s32.totalorder %s28_s24, 2  ;;  %p246_p2 = scmp.lt.s32.totalorder %s772_s23, 3 }
   0x5   : > { %s915_s24 = smov (%p30_p1, %s28_s24), 0  ;;  %p247_p3 = pnand %p656_p0, %p246_p2 }
   0x6   : > { %p290_p4 = scmp.lt.s32.totalorder (!%p247_p3), %s764_s21, 1  ;;  %v774_v0 = vmov (!%p247_p3), 0.0|0.0   ;;  %vm775_vm0 = vmmov (!%p247_p3), 0   ;;  %v776_v1 = vmov (!%p247_p3), 0.0   ;;  %v507_v2 = vld [vmem:[%s909_s4 + $0x10] sm:$0xff] (!%p247_p3)  ;;  %v777_v3 = vmov (!%p247_p3), 0  }
   0x7   : > { %250 = sbr.rel (%p247_p3) target bundleno = 254 (0xfe), region = 44  ;;  %710 = vmatprep.subr.bf16.mxu1 (!%p247_p3), %v774_v0  ;;  %713 = vmatprep.subr.bf16.mxu0 (!%p247_p3), %v774_v0  ;;  %v505_v4 = vld [vmem:[%s909_s4] sm:$0xff] (!%p247_p3)  ;;  %v506_v6 = vld [vmem:[%s909_s4 + $0x8] sm:$0xff] (!%p247_p3)  ;;  %v528_v13 = vld [vmem:[%s910_s5 + $0x10] sm:$0xff] (!%p247_p3)  ;;  %vm326_vm1 = vcmask (!%p247_p3), 195584   ;;  %vm547_vm2 = vcmask (!%p247_p3), 523264  }
   0x8   : > { %686 = vmatprep.mubr.msk.f32.mxu1 (!%p247_p3), %vm775_vm0, %v776_v1  ;;  %701 = vmatprep.mubr.msk.f32.mxu0 (!%p247_p3), %vm775_vm0, %v776_v1  ;;  %v526_v5 = vld [vmem:[%s910_s5] sm:$0xff] (!%p247_p3)  ;;  %v527_v14 = vld [vmem:[%s910_s5 + $0x8] sm:$0xff] (!%p247_p3)  ;;  %v322_v21 = vld [vmem:[%s908_s3 + $0x10] sm:$0xff] (!%p247_p3) }
   0x9   : > { %749 = vset.pattern.permute.xlu1 (!%p247_p3), %v777_v3  ;;  %748 = vset.pattern.permute.xlu0 (!%p247_p3), %v777_v3  ;;  %v320_v17 = vld [vmem:[%s908_s3] sm:$0xff] (!%p247_p3)  ;;  %v321_v19 = vld [vmem:[%s908_s3 + $0x8] sm:$0xff] (!%p247_p3)  ;;  %v316_v22 = vld [vmem:[%s907_s2 + $0x10] sm:$0xff] (!%p247_p3) }
   0xa   : > { %520 = vperm.xlu1 (!%p247_p3), %749, %v507_v2   ;;  %510 = vperm.xlu0 (!%p247_p3), %748, %v505_v4   ;;  %v314_v18 = vld [vmem:[%s907_s2] sm:$0xff] (!%p247_p3)  ;;  %v315_v20 = vld [vmem:[%s907_s2 + $0x8] sm:$0xff] (!%p247_p3) }
   0xe   : > { %s917_s21 = smov (!%p290_p4, %s764_s21), 1  ;;  %531 = vperm.xlu1 %749, %v526_v5   ;;  %515 = vperm.xlu0 %748, %v506_v6  }
   0xf   : > { %s839_s29 = smul.u32 24, %s917_s21 }
  0x11   : > { %s305_s12 = scalar_lea.vmem %s906_s1, %s839_s29  ;;  %s297_s15 = scalar_lea.vmem %s905_s0, %s839_s29 }
  0x12   : > { %v323_v7 = vld [vmem:[%s305_s12] sm:$0xff]  ;;  %v324_v8 = vld [vmem:[%s305_s12 + $0x8] sm:$0xff]  ;;  %v325_v15 = vld [vmem:[%s305_s12 + $0x10] sm:$0xff]  ;;  %541 = vperm.xlu1 %749, %v528_v13   ;;  %536 = vperm.xlu0 %748, %v527_v14   ;;  %s313_s14 = scalar_lea.vmem %s911_s6, %s839_s29 }
  0x13   : > { %v317_v9 = vld [vmem:[%s297_s15] sm:$0xff]  ;;  %v711_v10 = vpack.c.bf16 %v324_v8, %v323_v7  ;;  %v318_v11 = vld [vmem:[%s297_s15 + $0x8] sm:$0xff]  ;;  %v319_v16 = vld [vmem:[%s297_s15 + $0x10] sm:$0xff] }
  0x14   : > { %v714_v12 = vpack.c.bf16 %v318_v11, %v317_v9 }
  0x15   : > { %712 = vmatpush3.bf16.msra.mxu1 %v711_v10 }
  0x16   : > { %715 = vmatpush3.bf16.msra.mxu0 %v714_v12  ;;  %684 = vmatprep.subr.mxu1 %v776_v1 }
  0x17   : > { %699 = vmatprep.subr.mxu0 %v776_v1 }
  0x19   : > { %685 = vmatpush3.msra.mxu1 %v325_v15 }
  0x1a   : > { %700 = vmatpush3.msra.mxu0 %v319_v16  ;;  %687 = vmatmul.mubr.msk.f32.vlgmr.msra.gmra.mrb[0].mxu1 %vm326_vm1, %v320_v17 }
  0x1b   : > { %702 = vmatmul.mubr.msk.f32.vlgmr.msra.gmra.mrb[0].mxu0 %vm326_vm1, %v314_v18  ;;  %689 = vmatprep.mubr.msk.f32.mxu1 %vm775_vm0, %v776_v1 }
  0x1c   : > { %704 = vmatprep.mubr.msk.f32.mxu0 %vm775_vm0, %v776_v1 }
  0x1e   : > { %690 = vmatmul.mubr.msk.f32.gmra.mrb[2].mxu1 %vm326_vm1, %v321_v19 }
  0x1f   : > { %705 = vmatmul.mubr.msk.f32.gmra.mrb[2].mxu0 %vm326_vm1, %v315_v20  ;;  %692 = vmatprep.mubr.msk.f32.mxu1 %vm775_vm0, %v776_v1 }
  0x20   : > { %707 = vmatprep.mubr.msk.f32.mxu0 %vm775_vm0, %v776_v1 }
  0x22   : > { %693 = vmatmul.mubr.msk.f32.gmra.mrb[4].mxu1 %vm326_vm1, %v322_v21 }
  0x23   : > { %708 = vmatmul.mubr.msk.f32.gmra.mrb[4].mxu0 %vm326_vm1, %v316_v22 }
  0x89   : > { %v511_v23 = vpop.permute.xlu0 %510  ;;  %v521_v24 = vpop.permute.xlu1 %520 }
  0x8d   : > { %v516_v28 = vpop.permute.xlu0 %515  ;;  %v532_v31 = vpop.permute.xlu1 %531 }
  0x91   : > { %v537_v39 = vpop.permute.xlu0 %536  ;;  %v542_v48 = vpop.permute.xlu1 %541 }
  0xed   : > { %v402_v25 = vpop.f32.mrb[0].mxu1 }
  0xee   : > { %v491_v26 = vpop.f32.mrb[0].mxu0  ;;  %v688_v27 = vpop.f32.mrb[1].mxu1 }
  0xef   : > { %v492_v29 = vadd.f32 %v491_v26, %v402_v25  ;;  %v703_v30 = vpop.f32.mrb[1].mxu0 }
  0xf1   : > { %v523_v32 = vmul.f32 %v511_v23, %v492_v29  ;;  %v407_v33 = vpop.f32.mrb[2].mxu1 }
  0xf2   : > { %v496_v34 = vpop.f32.mrb[2].mxu0  ;;  %v691_v35 = vpop.f32.mrb[3].mxu1 }
  0xf3   : > { %v544_v36 = vadd.f32 %v532_v31, %v523_v32  ;;  %v497_v37 = vadd.f32 %v496_v34, %v407_v33  ;;  %v706_v38 = vpop.f32.mrb[3].mxu0 }
  0xf5   : > { %548 = vst.msk [vmem:[%s313_s14] sm:$0xff] %vm547_vm2, %v544_v36  ;;  %v524_v40 = vmul.f32 %v516_v28, %v497_v37  ;;  %v412_v41 = vpop.f32.mrb[4].mxu1 }
  0xf6   : > { %v501_v42 = vpop.f32.mrb[4].mxu0  ;;  %v694_v43 = vpop.f32.mrb[5].mxu1 }
  0xf7   : > { %v545_v44 = vadd.f32 %v537_v39, %v524_v40  ;;  %v502_v45 = vadd.f32 %v501_v42, %v412_v41  ;;  %v709_v46 = vpop.f32.mrb[5].mxu0 }
  0xf9   : > { %549 = vst.msk [vmem:[%s313_s14 + $0x8] sm:$0xff] %vm547_vm2, %v545_v44  ;;  %v525_v47 = vmul.f32 %v521_v24, %v502_v45 }
  0xfb   : > { %v546_v49 = vadd.f32 %v542_v48, %v525_v47 }
  0xfd   : > { %550 = vst.msk [vmem:[%s313_s14 + $0x10] sm:$0xff] %vm547_vm2, %v546_v49 }
  0xfe PF: > { %s16_s23 = sadd.s32 1, %s772_s23   ;;  %s912_s21 = smov %s768_s22 }
  0xff   : > { %p13_p5 = scmp.ge.s32.totalorder %s16_s23, 4   ;;  %s913_s22 = smov %s915_s24 }
 0x101   :  { %15 = sbr.rel (!%p13_p5) target bundleno = 2 (0x2), region = 77 }

// kernel: tic_sampling_forward.2
= control target key start
LH: loop header
LB: loop body
LE: loop exit
PB: predicated region body
PF: predicated region fallthrough
CT: control target
= control target key end

     0   :  { %s727_s18 = smov 0   ;;  %s729_s19 = smov 0   ;;  %s856_s0 = inlined_call_operand.vmem [shape: f32[2,24,64], index: 0, kind: input, shape index: {}]   ;;  %s857_s1 = inlined_call_operand.vmem [shape: f32[2,24,64], index: 1, kind: input, shape index: {}]   ;;  %s858_s2 = inlined_call_operand.vmem [shape: f32[24,24], index: 2, kind: input, shape index: {}]   ;;  %s859_s3 = inlined_call_operand.vmem [shape: f32[24,24], index: 3, kind: input, shape index: {}]   ;;  %s860_s4 = inlined_call_operand.vmem [shape: f32[24,1], index: 4, kind: output, shape index: {0}]   ;;  %s861_s5 = inlined_call_operand.vmem [shape: f32[24,1], index: 5, kind: output, shape index: {1}]  }
   0x1   :  { %s731_s20 = smov 0  }
   0x2 LB: > { %s28_s21 = sadd.s32 1, %s687_s19  ;;  %p576_p0 = scmp.ge.s32.totalorder %s691_s20, 1  ;;  %s691_s20 = sphi %s731_s20, %s16_s20   ;;  %s687_s19 = sphi %s729_s19, %s863_s19   ;;  %s683_s18 = sphi %s727_s18, %s862_s18  }
   0x3   : > { %p30_p1 = scmp.ge.s32.totalorder %s28_s21, 2  ;;  %p212_p2 = scmp.lt.s32.totalorder %s691_s20, 3 }
   0x5   : > { %s865_s21 = smov (%p30_p1, %s28_s21), 0  ;;  %p213_p3 = pnand %p576_p0, %p212_p2 }
   0x6   : > { %p246_p4 = scmp.lt.s32.totalorder (!%p213_p3), %s683_s18, 1  ;;  %p262_p5 = scmp.eq.s32.totalorder (!%p213_p3), %s683_s18, 0 }
   0x7   : > { %216 = sbr.rel (%p213_p3) target bundleno = 402 (0x192), region = 36 }
   0xe   : > { %s867_s18 = smov (!%p246_p4, %s683_s18), 1  ;;  %267 = sbr.rel (!%p262_p5) target bundleno = 21 (0x15), region = 40 }
   0xf   : > { %s640_s22 = smul.u32 24, %s867_s18  ;;  %vm268_vm0 = vcmask (%p262_p5), 7168   ;;  %v693_v0 = vmov (%p262_p5), 0.0  }
  0x10   : > { %269 = vst.msk [vmem:[%s860_s4] sm:$0xff] (%p262_p5), %vm268_vm0, %v693_v0  ;;  %270 = vst.msk [vmem:[%s860_s4 + $0x8] sm:$0xff] (%p262_p5), %vm268_vm0, %v693_v0 }
  0x11   : > { %s253_s25 = scalar_lea.vmem %s856_s0, %s640_s22  ;;  %s261_s28 = scalar_lea.vmem %s857_s1, %s640_s22  ;;  %271 = vst.msk [vmem:[%s860_s4 + $0x10] sm:$0xff] (%p262_p5), %vm268_vm0, %v693_v0  ;;  %272 = vst.msk [vmem:[%s861_s5] sm:$0xff] (%p262_p5), %vm268_vm0, %v693_v0 }
  0x12   : > { %273 = vst.msk [vmem:[%s861_s5 + $0x8] sm:$0xff] (%p262_p5), %vm268_vm0, %v693_v0  ;;  %274 = vst.msk [vmem:[%s861_s5 + $0x10] sm:$0xff] (%p262_p5), %vm268_vm0, %v693_v0 }
  0x15 PF: > { %v284_v1 = vld [vmem:[%s261_s28] sm:$0xff]  ;;  %v285_v2 = vld [vmem:[%s261_s28 + $0x8] sm:$0xff]  ;;  %v694_v4 = vmov 0.0|0.0   ;;  %vm695_vm1 = vmmov 0   ;;  %v696_v8 = vmov 0.0   ;;  %v286_v9 = vld [vmem:[%s261_s28 + $0x10] sm:$0xff] }
  0x16   : > { %v278_v3 = vld [vmem:[%s253_s25] sm:$0xff]  ;;  %631 = vmatprep.subr.bf16.mxu1 %v694_v4  ;;  %634 = vmatprep.subr.bf16.mxu0 %v694_v4  ;;  %v632_v5 = vpack.c.bf16 %v285_v2, %v284_v1  ;;  %v279_v6 = vld [vmem:[%s253_s25 + $0x8] sm:$0xff]  ;;  %v280_v10 = vld [vmem:[%s253_s25 + $0x10] sm:$0xff]  ;;  %vm287_vm2 = vcmask 195584   ;;  %vm469_vm3 = vcmask 523264   ;;  %vm482_vm4 = vcmask 7168  }
  0x17   : > { %v635_v7 = vpack.c.bf16 %v279_v6, %v278_v3  ;;  %607 = vmatprep.mubr.msk.f32.mxu1 %vm695_vm1, %v696_v8  ;;  %622 = vmatprep.mubr.msk.f32.mxu0 %vm695_vm1, %v696_v8  ;;  %v281_v11 = vld [vmem:[%s859_s3] sm:$0xff]  ;;  %v282_v13 = vld [vmem:[%s859_s3 + $0x8] sm:$0xff]  ;;  %v283_v15 = vld [vmem:[%s859_s3 + $0x10] sm:$0xff] }
  0x18   : > { %633 = vmatpush3.bf16.msra.mxu1 %v632_v5  ;;  %v275_v12 = vld [vmem:[%s858_s2] sm:$0xff]  ;;  %v276_v14 = vld [vmem:[%s858_s2 + $0x8] sm:$0xff]  ;;  %v277_v16 = vld [vmem:[%s858_s2 + $0x10] sm:$0xff] }
  0x19   : > { %636 = vmatpush3.bf16.msra.mxu0 %v635_v7  ;;  %605 = vmatprep.subr.mxu1 %v696_v8  ;;  %v466_v41 = vld [vmem:[%s860_s4] sm:$0xff]  ;;  %v467_v46 = vld [vmem:[%s860_s4 + $0x8] sm:$0xff]  ;;  %v468_v51 = vld [vmem:[%s860_s4 + $0x10] sm:$0xff] }
  0x1a   : > { %620 = vmatprep.subr.mxu0 %v696_v8  ;;  %v486_v43 = vld [vmem:[%s861_s5] sm:$0xff]  ;;  %v487_v50 = vld [vmem:[%s861_s5 + $0x8] sm:$0xff]  ;;  %v488_v56 = vld [vmem:[%s861_s5 + $0x10] sm:$0xff] }
  0x1c   : > { %606 = vmatpush3.msra.mxu1 %v286_v9 }
  0x1d   : > { %621 = vmatpush3.msra.mxu0 %v280_v10  ;;  %608 = vmatmul.mubr.msk.f32.vlgmr.msra.gmra.mrb[0].mxu1 %vm287_vm2, %v281_v11 }
  0x1e   : > { %623 = vmatmul.mubr.msk.f32.vlgmr.msra.gmra.mrb[0].mxu0 %vm287_vm2, %v275_v12  ;;  %610 = vmatprep.mubr.msk.f32.mxu1 %vm695_vm1, %v696_v8 }
  0x1f   : > { %625 = vmatprep.mubr.msk.f32.mxu0 %vm695_vm1, %v696_v8 }
  0x21   : > { %611 = vmatmul.mubr.msk.f32.gmra.mrb[2].mxu1 %vm287_vm2, %v282_v13 }
  0x22   : > { %626 = vmatmul.mubr.msk.f32.gmra.mrb[2].mxu0 %vm287_vm2, %v276_v14  ;;  %613 = vmatprep.mubr.msk.f32.mxu1 %vm695_vm1, %v696_v8 }
  0x23   : > { %628 = vmatprep.mubr.msk.f32.mxu0 %vm695_vm1, %v696_v8 }
  0x25   : > { %614 = vmatmul.mubr.msk.f32.gmra.mrb[4].mxu1 %vm287_vm2, %v283_v15 }
  0x26   : > { %629 = vmatmul.mubr.msk.f32.gmra.mrb[4].mxu0 %vm287_vm2, %v277_v16 }
  0xf0   : > { %v363_v17 = vpop.f32.mrb[0].mxu1 }
  0xf1   : > { %v452_v18 = vpop.f32.mrb[0].mxu0  ;;  %v609_v19 = vpop.f32.mrb[1].mxu1 }
  0xf2   : > { %v453_v20 = vadd.f32 %v452_v18, %v363_v17  ;;  %v624_v21 = vpop.f32.mrb[1].mxu0 }
  0xf4   : > { %v368_v22 = vpop.f32.mrb[2].mxu1  ;;  %v470_v23 = vsel %vm469_vm3, %v453_v20, 0.0  ;;  %v489_v24 = vmul.f32 %v453_v20, %v453_v20 }
  0xf5   : > { %471 = vadd.xlane.f32.xlu0 %v470_v23  ;;  %v457_v25 = vpop.f32.mrb[2].mxu0  ;;  %v612_v26 = vpop.f32.mrb[3].mxu1 }
  0xf6   : > { %v458_v27 = vadd.f32 %v457_v25, %v368_v22  ;;  %v627_v28 = vpop.f32.mrb[3].mxu0  ;;  %v492_v29 = vsel %vm469_vm3, %v489_v24, 0.0 }
  0xf7   : > { %493 = vadd.xlane.f32.xlu1 %v492_v29 }
  0xf8   : > { %v373_v30 = vpop.f32.mrb[4].mxu1  ;;  %v473_v31 = vsel %vm469_vm3, %v458_v27, 0.0  ;;  %v490_v32 = vmul.f32 %v458_v27, %v458_v27 }
  0xf9   : > { %474 = vadd.xlane.f32.xlu0 %v473_v31  ;;  %v462_v33 = vpop.f32.mrb[4].mxu0  ;;  %v615_v34 = vpop.f32.mrb[5].mxu1 }
  0xfa   : > { %v463_v35 = vadd.f32 %v462_v33, %v373_v30  ;;  %v630_v36 = vpop.f32.mrb[5].mxu0  ;;  %v495_v37 = vsel %vm469_vm3, %v490_v32, 0.0 }
  0xfc   : > { %v476_v38 = vsel %vm469_vm3, %v463_v35, 0.0  ;;  %v491_v39 = vmul.f32 %v463_v35, %v463_v35 }
  0xfd   : > { %496 = vadd.xlane.f32.xlu0 %v495_v37  ;;  %477 = vadd.xlane.f32.xlu1 %v476_v38 }
  0xfe   : > { %v498_v40 = vsel %vm469_vm3, %v491_v39, 0.0 }
 0x101   : > { %499 = vadd.xlane.f32.xlu1 %v498_v40 }
 0x182   : > { %v472_v42 = vpop.xlane.xlu0 %471 }
 0x183   : > { %v479_v44 = vadd.f32 %v472_v42, %v466_v41 }
 0x184   : > { %v494_v45 = vpop.xlane.xlu1 %493 }
 0x185   : > { %483 = vst.msk [vmem:[%s860_s4] sm:$0xff] %vm482_vm4, %v479_v44  ;;  %v501_v47 = vadd.f32 %v494_v45, %v486_v43 }
 0x186   : > { %v475_v48 = vpop.xlane.xlu0 %474 }
 0x187   : > { %504 = vst.msk [vmem:[%s861_s5] sm:$0xff] %vm482_vm4, %v501_v47  ;;  %v480_v49 = vadd.f32 %v475_v48, %v467_v46 }
 0x189   : > { %484 = vst.msk [vmem:[%s860_s4 + $0x8] sm:$0xff] %vm482_vm4, %v480_v49 }
 0x18a   : > { %v497_v52 = vpop.xlane.xlu0 %496  ;;  %v478_v53 = vpop.xlane.xlu1 %477 }
 0x18b   : > { %v502_v54 = vadd.f32 %v497_v52, %v487_v50  ;;  %v481_v55 = vadd.f32 %v478_v53, %v468_v51 }
 0x18d   : > { %505 = vst.msk [vmem:[%s861_s5 + $0x8] sm:$0xff] %vm482_vm4, %v502_v54  ;;  %485 = vst.msk [vmem:[%s860_s4 + $0x10] sm:$0xff] %vm482_vm4, %v481_v55 }
 0x18e   : > { %v500_v57 = vpop.xlane.xlu1 %499 }
 0x18f   : > { %v503_v58 = vadd.f32 %v500_v57, %v488_v56 }
 0x191   : > { %506 = vst.msk [vmem:[%s861_s5 + $0x10] sm:$0xff] %vm482_vm4, %v503_v58 }
 0x192 PF: > { %s16_s20 = sadd.s32 1, %s691_s20   ;;  %s862_s18 = smov %s687_s19 }
 0x193   : > { %p13_p6 = scmp.ge.s32.totalorder %s16_s20, 4   ;;  %s863_s19 = smov %s865_s21 }
 0x195   :  { %15 = sbr.rel (!%p13_p6) target bundleno = 2 (0x2), region = 77 }

</bundles_post_ra>
